<compile_context>
chip_gen: v7x
topology: tpu7x:2x2x1
jax: 0.10.0
libtpu: 0.0.40
codegen_flags: <defaults>
</compile_context>

<pallas_src>
import jax
import jax.numpy as jnp
from jax import lax
from jax.experimental import pallas as pl
from jax.experimental.pallas import tpu as pltpu

_CHUNK = 8  # D-rows handled per aligned load/store chunk in the sequential kernel


def _pick_batch_tile(b_padded):
    """Lane-dense batch tile; >=2 grid blocks when possible (v7x has 2 TCs
    sharded over the 'parallel' axis); extra grid steps are cheap on v5e/v6e."""
    if b_padded >= 256 and b_padded % 128 == 0:
        return 128
    for t in (512, 256, 128, 64, 32, 16, 8):
        if b_padded % t == 0:
            return t
    return b_padded


# ----------------------------------------------------------------------------
# Sequential (general) kernel: handles unobserved entries (x_i < 0).
# Layout: D on sublanes, batch on lanes; hidden accumulator is (H, TB).
# ----------------------------------------------------------------------------
def nade_seq_kernel(x_ref, lu_ref, hw_ref, iw_ref, in_b_ref, h_b_ref, out_ref):
    # x_ref, lu_ref, out_ref : (Dp, TB)    D on sublanes, batch on lanes
    # hw_ref, iw_ref         : (NC, H, CH) chunk c, lane k = h_W[c*CH+k,:] / in_W[:,c*CH+k]
    # in_b_ref               : (H, 1)
    # h_b_ref                : (Dp, 1)
    _, TB = x_ref.shape
    NC, H, CH = hw_ref.shape

    a0 = jnp.broadcast_to(in_b_ref[...], (H, TB))        # a = in_b.expand(B, -1)

    def chunk(c, a):
        base = pl.multiple_of(c * CH, CH)
        hw_c = hw_ref[c]                                  # (H, CH)
        iw_c = iw_ref[c]                                  # (H, CH)
        x_c = x_ref[pl.ds(base, CH), :]                   # (CH, TB) aligned load
        lu_c = lu_ref[pl.ds(base, CH), :]                 # (CH, TB)
        hb_c = h_b_ref[pl.ds(base, CH), :]                # (CH, 1)

        rows = []
        for k in range(CH):                               # unrolled, static in-chunk index
            h = jnp.maximum(a, 0.0)                       # relu(a), (H, TB)
            hw_col = hw_c[:, k:k + 1]                     # (H, 1) = h_W[i, :]
            # partial logit (h_b[i] added at the store); XLU sublane reduce.
            partial = jnp.sum(h * hw_col, axis=0, keepdims=True)   # (1, TB)
            rows.append(partial)

            x_i = x_c[k:k + 1, :]                         # (1, TB) = x[:, i]
            lu_i = lu_c[k:k + 1, :]                       # (1, TB) = logit(u) - h_b[i]
            # Bernoulli(p_i).sample() via inverse CDF: u < p_i  <=>  logit(u) < logit_i
            bern = (lu_i < partial).astype(jnp.float32)
            x_i = jnp.where(x_i < 0.0, bern, x_i)         # torch.where(x_i < 0, ...)

            iw_col = iw_c[:, k:k + 1]                     # (H, 1) = in_W[:, i]
            a = a + iw_col * x_i                          # rank-1 update, (H, TB)

        logits = jnp.concatenate(rows, axis=0)            # (CH, TB) lane-dense store
        out_ref[pl.ds(base, CH), :] = jax.nn.sigmoid(logits + hb_c)
        return a

    lax.fori_loop(0, NC, chunk, a0)


def nade_forward(x, u, in_W, in_b, h_W, h_b, *, batch_tile=None):
    """General NADE forward. x: (B, D) with x < 0 meaning "unobserved"; u: (B, D)
    uniforms for the Bernoulli fallback (torch's RNG cannot be reproduced).
    Returns p_hat: (B, D)."""
    B, D = x.shape
    H = in_W.shape[0]
    CH = _CHUNK
    Dp = ((D + CH - 1) // CH) * CH
    Bp = ((B + 7) // 8) * 8

    x = x.astype(jnp.float32)
    u = u.astype(jnp.float32)
    in_W = in_W.astype(jnp.float32)
    in_b = in_b.astype(jnp.float32)
    h_W = h_W.astype(jnp.float32)
    h_b = h_b.astype(jnp.float32)

    # logit(u) - h_b: the in-loop Bernoulli test needs no bias add (h_b is added
    # back at the sigmoid). Clip keeps u->0/1 finite; comparisons are unchanged.
    lu = jnp.clip(jnp.log(u) - jnp.log1p(-u), -1e30, 1e30) - h_b[None, :]

    # (D, B) layout: D on sublanes, batch on lanes (lane-dense loads / stores).
    xT = jnp.pad(jnp.transpose(x), ((0, Dp - D), (0, Bp - B)))
    luT = jnp.pad(jnp.transpose(lu), ((0, Dp - D), (0, Bp - B)))
    hW_p = jnp.pad(h_W, ((0, Dp - D), (0, 0)))             # (Dp, H)
    iWT_p = jnp.pad(in_W.T, ((0, Dp - D), (0, 0)))         # (Dp, H): row i = in_W[:, i]
    hb_p = jnp.pad(h_b, (0, Dp - D)).reshape(Dp, 1)

    # Pre-chunked, pre-transposed weights so the kernel never slices the lane
    # dim dynamically: chunk c, lane k holds the column for step i = c*CH + k.
    NC = Dp // CH
    hw_ch = hW_p.reshape(NC, CH, H).transpose(0, 2, 1)     # (NC, H, CH)
    iw_ch = iWT_p.reshape(NC, CH, H).transpose(0, 2, 1)    # (NC, H, CH)

    tb = batch_tile or _pick_batch_tile(Bp)

    out = pl.pallas_call(
        nade_seq_kernel,
        out_shape=jax.ShapeDtypeStruct((Dp, Bp), jnp.float32),
        grid=(Bp // tb,),
        in_specs=[
            pl.BlockSpec((Dp, tb), lambda b: (0, b)),        # x   (D, batch)
            pl.BlockSpec((Dp, tb), lambda b: (0, b)),        # logit(u) - h_b
            pl.BlockSpec((NC, H, CH), lambda b: (0, 0, 0)),  # h_W chunks
            pl.BlockSpec((NC, H, CH), lambda b: (0, 0, 0)),  # in_W chunks
            pl.BlockSpec((H, 1), lambda b: (0, 0)),          # in_b
            pl.BlockSpec((Dp, 1), lambda b: (0, 0)),         # h_b
        ],
        out_specs=pl.BlockSpec((Dp, tb), lambda b: (0, b)),
        compiler_params=pltpu.CompilerParams(
            dimension_semantics=("parallel",)),
    )(xT, luT, hw_ch, iw_ch, in_b.reshape(H, 1), hb_p)
    return jnp.transpose(out)[:B, :D]


# ----------------------------------------------------------------------------
# Dense teacher-forced fast path: valid only when all x >= 0 (fully observed).
# 8 samples are folded into the M dimension of one bf16 MXU causal matmul.
# ----------------------------------------------------------------------------
def nade_dense_kernel(x_ref, in_w_t_ref, in_b_ref, h_w_ref, h_b_ref, p_ref):
    # x_ref, p_ref : (TB, Dp)  batch on sublanes, D on lanes (lane-dense output)
    # in_w_t_ref   : (Dp, H) = in_W.T;   h_w_ref : (Dp, H)
    # in_b_ref     : (1, H);  h_b_ref : (1, Dp)
    TB, Dp = x_ref.shape
    G = 8                                   # samples per MXU matmul (folded into M)

    # Strictly-lower-triangular mask tiled G times: ltri_t[b*Dp + i, j] = (j < i)
    r = lax.broadcasted_iota(jnp.int32, (G * Dp, Dp), 0)
    i_idx = lax.rem(r, Dp)
    j_idx = lax.broadcasted_iota(jnp.int32, (G * Dp, Dp), 1)
    ltri_t = (j_idx < i_idx).astype(jnp.bfloat16)            # 0/1, exact in bf16
    # TODO(synk): for large D, build the causal mask per (Dt, Dt) tile and skip
    # the all-zero upper-triangular tiles to stay inside v7x's 64 MiB VMEM.

    wt_b = in_w_t_ref[...].astype(jnp.bfloat16)              # (Dp, H)
    hw = h_w_ref[...]                                        # (Dp, H), f32
    in_b = in_b_ref[...]                                     # (1, H)
    h_b = h_b_ref[...]                                       # (1, Dp)

    @pl.loop(0, TB // G)
    def _(g):
        base = pl.multiple_of(g * G, G)
        xg = x_ref[pl.ds(base, G), :].astype(jnp.bfloat16)   # (G, Dp); 0/1 exact in bf16
        # x_rep[b*Dp + i, j] = x[b, j]
        x_rep = jnp.concatenate(
            [jnp.broadcast_to(xg[b:b + 1, :], (Dp, Dp)) for b in range(G)], axis=0)
        s = ltri_t * x_rep                                   # (G*Dp, Dp) bf16
        # a[b*Dp + i, h] = sum_{j<i} x[b, j] * in_W[h, j]    -- one MXU dot per group
        a = jnp.dot(s, wt_b, preferred_element_type=jnp.float32)   # (G*Dp, H) f32
        hact = jnp.maximum(a + in_b, 0.0)                    # relu
        hact3 = hact.reshape(G, Dp, H)                       # leading-dim split (layout-safe)
        logits = jnp.sum(hact3 * hw[None, :, :], axis=2)     # (G, Dp)
        p_ref[pl.ds(base, G), :] = jax.nn.sigmoid(logits + h_b)


def nade_forward_observed(x, in_W, in_b, h_W, h_b, *, batch_tile=None):
    """Fast path: requires every entry of x to be observed (x >= 0)."""
    B, D = x.shape
    H = in_W.shape[0]
    Dp = ((D + 7) // 8) * 8
    Bp = ((B + 7) // 8) * 8

    xp = jnp.pad(x.astype(jnp.float32), ((0, Bp - B), (0, Dp - D)))
    iWT = jnp.pad(in_W.T.astype(jnp.float32), ((0, Dp - D), (0, 0)))
    hWp = jnp.pad(h_W.astype(jnp.float32), ((0, Dp - D), (0, 0)))
    hbp = jnp.pad(h_b.astype(jnp.float32), (0, Dp - D)).reshape(1, Dp)

    tb = batch_tile or _pick_batch_tile(Bp)

    p = pl.pallas_call(
        nade_dense_kernel,
        out_shape=jax.ShapeDtypeStruct((Bp, Dp), jnp.float32),
        grid=(Bp // tb,),
        in_specs=[
            pl.BlockSpec((tb, Dp), lambda b: (b, 0)),        # x (batch, D)
            pl.BlockSpec((Dp, H), lambda b: (0, 0)),         # in_W.T
            pl.BlockSpec((1, H), lambda b: (0, 0)),          # in_b
            pl.BlockSpec((Dp, H), lambda b: (0, 0)),         # h_W
            pl.BlockSpec((1, Dp), lambda b: (0, 0)),         # h_b
        ],
        out_specs=pl.BlockSpec((tb, Dp), lambda b: (b, 0)),
        compiler_params=pltpu.CompilerParams(
            dimension_semantics=("parallel",)),
    )(xp, iWT, in_b.reshape(1, H).astype(jnp.float32), hWp, hbp)
    return p[:B, :D]


# ----------------------------------------------------------------------------
# Pure-JAX reference mirroring the PyTorch loop (the Bernoulli sample is the
# same inverse-CDF comparison, mathematically identical to `u < p_i`).
# ----------------------------------------------------------------------------
def nade_ref(x, u, in_W, in_b, h_W, h_b):
    B, D = x.shape
    H = in_b.shape[0]
    Wt = in_W.T                                              # (D, H)
    lu = jnp.clip(jnp.log(u) - jnp.log1p(-u), -1e30, 1e30)
    a = jnp.broadcast_to(in_b[None, :], (B, H))
    ps = []
    for i in range(D):
        h = jnp.maximum(a, 0.0)
        logit = jnp.sum(h * h_W[i][None, :], axis=1, keepdims=True) + h_b[i]
        ps.append(jax.nn.sigmoid(logit))
        bern = (lu[:, i:i + 1] < logit).astype(jnp.float32)  # == Bernoulli(p_i)
        x_i = jnp.where(x[:, i:i + 1] < 0, bern, x[:, i:i + 1])
        a = a + x_i * Wt[i][None, :]
    return jnp.concatenate(ps, axis=1)


if __name__ == "__main__":
    key = jax.random.PRNGKey(0)
    B, D, H = 256, 64, 32   # batch, input_dim, hidden_dim

    k_x, k_u, k_w1, k_w2, k_b1, k_b2, k_m = jax.random.split(key, 7)

    in_W = jax.random.normal(k_w1, (H, D), jnp.float32) * jnp.sqrt(2.0 / D)   # _in_W
    in_b = 0.1 * jax.random.normal(k_b1, (H,), jnp.float32)                   # _in_b
    h_W = jax.random.normal(k_w2, (D, H), jnp.float32) * jnp.sqrt(2.0 / H)    # _h_W
    h_b = 0.1 * jax.random.normal(k_b2, (D,), jnp.float32)                    # _h_b

    x = jax.random.bernoulli(k_x, 0.3, (B, D)).astype(jnp.float32)  # observed data
    u = jax.random.uniform(k_u, (B, D), jnp.float32)                # Bernoulli uniforms

    # 1) General autoregressive kernel, fully observed input (no Bernoulli used).
    p_seq = jax.block_until_ready(nade_forward(x, u, in_W, in_b, h_W, h_b))
    p_ref = nade_ref(x, u, in_W, in_b, h_W, h_b)
    assert p_seq.shape == (B, D)
    assert jnp.allclose(p_seq, p_ref, atol=1e-4, rtol=1e-4), (
        float(jnp.max(jnp.abs(p_seq - p_ref))))

    # 2) Sampling path: some entries unobserved (-1) -> Bernoulli fallback.
    #    Bernoulli draws are threshold comparisons; a ~1e-6 logit difference in
    #    reduction order can flip a draw and diverge one sample's trajectory, so
    #    check the mismatch fraction rather than strict allclose.
    x_mix = jnp.where(jax.random.uniform(k_m, (B, D)) < 0.25, -1.0, x)
    p_mix = jax.block_until_ready(nade_forward(x_mix, u, in_W, in_b, h_W, h_b))
    p_mix_ref = nade_ref(x_mix, u, in_W, in_b, h_W, h_b)
    mismatch = float(jnp.mean((jnp.abs(p_mix - p_mix_ref) > 1e-3).astype(jnp.float32)))
    assert mismatch < 0.01, mismatch

    # 3) Dense teacher-forced fast path (bf16 MXU, f32 accumulation).
    p_dense = jax.block_until_ready(nade_forward_observed(x, in_W, in_b, h_W, h_b))
    assert jnp.allclose(p_dense, p_ref, atol=5e-3, rtol=5e-3), (
        float(jnp.max(jnp.abs(p_dense - p_ref))))

    print("KERNEL_OK")
</pallas_src>

<mosaic_0001>
module attributes {stable_mosaic.version = 11 : i64} {
  func.func @nade_seq_kernel(%arg0: i32, %arg1: memref<64x128xf32, #tpu.memory_space<vmem>>, %arg2: memref<64x128xf32, #tpu.memory_space<vmem>>, %arg3: memref<8x32x8xf32, #tpu.memory_space<vmem>>, %arg4: memref<8x32x8xf32, #tpu.memory_space<vmem>>, %arg5: memref<32x1xf32, #tpu.memory_space<vmem>>, %arg6: memref<64x1xf32, #tpu.memory_space<vmem>>, %arg7: memref<64x128xf32, #tpu.memory_space<vmem>>) attributes {dimension_semantics = [#tpu.dimension_semantics<parallel>], iteration_bounds = array<i64: 2>, scalar_prefetch = 0 : i64, scratch_operands = 0 : i64, tpu.core_type = #tpu.core_type<tc>, window_params = [{transform_indices = @transform_0, window_bounds = array<i64: 64, 128>}, {transform_indices = @transform_1, window_bounds = array<i64: 64, 128>}, {pipeline_mode = #tpu.pipeline_mode<synchronous>, transform_indices = @transform_2, window_bounds = array<i64: 8, 32, 8>}, {pipeline_mode = #tpu.pipeline_mode<synchronous>, transform_indices = @transform_3, window_bounds = array<i64: 8, 32, 8>}, {pipeline_mode = #tpu.pipeline_mode<synchronous>, transform_indices = @transform_4, window_bounds = array<i64: 32, 1>}, {pipeline_mode = #tpu.pipeline_mode<synchronous>, transform_indices = @transform_5, window_bounds = array<i64: 64, 1>}, {transform_indices = @transform_6, window_bounds = array<i64: 64, 128>}]} {
    %c0 = arith.constant 0 : index
    %c0_0 = arith.constant 0 : index
    %0 = vector.load %arg5[%c0, %c0_0] : memref<32x1xf32, #tpu.memory_space<vmem>>, vector<32x1xf32>
    %1 = vector.shape_cast %0 : vector<32x1xf32> to vector<32x1xf32>
    %2 = vector.broadcast %1 : vector<32x1xf32> to vector<32x128xf32>
    %c0_i32 = arith.constant 0 : i32
    %c8_i32 = arith.constant 8 : i32
    %3 = arith.addi %c0_i32, %c8_i32 : i32
    %c1_i32 = arith.constant 1 : i32
    %4 = scf.for %arg8 = %c0_i32 to %3 step %c1_i32 iter_args(%arg9 = %2) -> (vector<32x128xf32>)  : i32 {
      %c8_i32_2 = arith.constant 8 : i32
      %5 = arith.muli %arg8, %c8_i32_2 : i32
      %6 = tpu.assume_multiple %5, 8 : i32
      %7 = arith.index_cast %arg8 : i32 to index
      %c0_3 = arith.constant 0 : index
      %c0_4 = arith.constant 0 : index
      %8 = vector.load %arg3[%7, %c0_3, %c0_4] : memref<8x32x8xf32, #tpu.memory_space<vmem>>, vector<1x32x8xf32>
      %9 = vector.shape_cast %8 : vector<1x32x8xf32> to vector<32x8xf32>
      %10 = arith.index_cast %arg8 : i32 to index
      %c0_5 = arith.constant 0 : index
      %c0_6 = arith.constant 0 : index
      %11 = vector.load %arg4[%10, %c0_5, %c0_6] : memref<8x32x8xf32, #tpu.memory_space<vmem>>, vector<1x32x8xf32>
      %12 = vector.shape_cast %11 : vector<1x32x8xf32> to vector<32x8xf32>
      %13 = arith.index_cast %6 : i32 to index
      %c0_7 = arith.constant 0 : index
      %14 = vector.load %arg1[%13, %c0_7] : memref<64x128xf32, #tpu.memory_space<vmem>>, vector<8x128xf32>
      %15 = arith.index_cast %6 : i32 to index
      %c0_8 = arith.constant 0 : index
      %16 = vector.load %arg2[%15, %c0_8] : memref<64x128xf32, #tpu.memory_space<vmem>>, vector<8x128xf32>
      %17 = arith.index_cast %6 : i32 to index
      %c0_9 = arith.constant 0 : index
      %18 = vector.load %arg6[%17, %c0_9] : memref<64x1xf32, #tpu.memory_space<vmem>>, vector<8x1xf32>
      %cst = arith.constant 0.000000e+00 : f32
      %19 = vector.broadcast %cst : f32 to vector<32x128xf32>
      %20 = arith.maximumf %arg9, %19 : vector<32x128xf32>
      %21 = vector.extract_strided_slice %9 {offsets = [0, 0], sizes = [32, 1], strides = [1, 1]} : vector<32x8xf32> to vector<32x1xf32>
      %22 = vector.broadcast %21 : vector<32x1xf32> to vector<32x128xf32>
      %23 = arith.mulf %20, %22 : vector<32x128xf32>
      %cst_10 = arith.constant dense<0.000000e+00> : vector<128xf32>
      %24 = vector.multi_reduction <add>, %23, %cst_10 [0] : vector<32x128xf32> to vector<128xf32>
      %25 = vector.shape_cast %24 : vector<128xf32> to vector<1x128xf32>
      %26 = vector.extract_strided_slice %14 {offsets = [0, 0], sizes = [1, 128], strides = [1, 1]} : vector<8x128xf32> to vector<1x128xf32>
      %27 = vector.extract_strided_slice %16 {offsets = [0, 0], sizes = [1, 128], strides = [1, 1]} : vector<8x128xf32> to vector<1x128xf32>
      %28 = arith.cmpf olt, %27, %25 : vector<1x128xf32>
      %29 = arith.extui %28 : vector<1x128xi1> to vector<1x128xi32>
      %30 = arith.sitofp %29 : vector<1x128xi32> to vector<1x128xf32>
      %cst_11 = arith.constant 0.000000e+00 : f32
      %31 = vector.broadcast %cst_11 : f32 to vector<1x128xf32>
      %32 = arith.cmpf olt, %26, %31 : vector<1x128xf32>
      %33 = arith.select %32, %30, %26 : vector<1x128xi1>, vector<1x128xf32>
      %34 = vector.extract_strided_slice %12 {offsets = [0, 0], sizes = [32, 1], strides = [1, 1]} : vector<32x8xf32> to vector<32x1xf32>
      %35 = vector.broadcast %34 : vector<32x1xf32> to vector<32x128xf32>
      %36 = vector.broadcast %33 : vector<1x128xf32> to vector<32x128xf32>
      %37 = arith.mulf %35, %36 : vector<32x128xf32>
      %38 = arith.addf %arg9, %37 : vector<32x128xf32>
      %cst_12 = arith.constant 0.000000e+00 : f32
      %39 = vector.broadcast %cst_12 : f32 to vector<32x128xf32>
      %40 = arith.maximumf %38, %39 : vector<32x128xf32>
      %41 = vector.extract_strided_slice %9 {offsets = [0, 1], sizes = [32, 1], strides = [1, 1]} : vector<32x8xf32> to vector<32x1xf32>
      %42 = vector.broadcast %41 : vector<32x1xf32> to vector<32x128xf32>
      %43 = arith.mulf %40, %42 : vector<32x128xf32>
      %cst_13 = arith.constant dense<0.000000e+00> : vector<128xf32>
      %44 = vector.multi_reduction <add>, %43, %cst_13 [0] : vector<32x128xf32> to vector<128xf32>
      %45 = vector.shape_cast %44 : vector<128xf32> to vector<1x128xf32>
      %46 = vector.extract_strided_slice %14 {offsets = [1, 0], sizes = [1, 128], strides = [1, 1]} : vector<8x128xf32> to vector<1x128xf32>
      %47 = vector.extract_strided_slice %16 {offsets = [1, 0], sizes = [1, 128], strides = [1, 1]} : vector<8x128xf32> to vector<1x128xf32>
      %48 = arith.cmpf olt, %47, %45 : vector<1x128xf32>
      %49 = arith.extui %48 : vector<1x128xi1> to vector<1x128xi32>
      %50 = arith.sitofp %49 : vector<1x128xi32> to vector<1x128xf32>
      %cst_14 = arith.constant 0.000000e+00 : f32
      %51 = vector.broadcast %cst_14 : f32 to vector<1x128xf32>
      %52 = arith.cmpf olt, %46, %51 : vector<1x128xf32>
      %53 = arith.select %52, %50, %46 : vector<1x128xi1>, vector<1x128xf32>
      %54 = vector.extract_strided_slice %12 {offsets = [0, 1], sizes = [32, 1], strides = [1, 1]} : vector<32x8xf32> to vector<32x1xf32>
      %55 = vector.broadcast %54 : vector<32x1xf32> to vector<32x128xf32>
      %56 = vector.broadcast %53 : vector<1x128xf32> to vector<32x128xf32>
      %57 = arith.mulf %55, %56 : vector<32x128xf32>
      %58 = arith.addf %38, %57 : vector<32x128xf32>
      %cst_15 = arith.constant 0.000000e+00 : f32
      %59 = vector.broadcast %cst_15 : f32 to vector<32x128xf32>
      %60 = arith.maximumf %58, %59 : vector<32x128xf32>
      %61 = vector.extract_strided_slice %9 {offsets = [0, 2], sizes = [32, 1], strides = [1, 1]} : vector<32x8xf32> to vector<32x1xf32>
      %62 = vector.broadcast %61 : vector<32x1xf32> to vector<32x128xf32>
      %63 = arith.mulf %60, %62 : vector<32x128xf32>
      %cst_16 = arith.constant dense<0.000000e+00> : vector<128xf32>
      %64 = vector.multi_reduction <add>, %63, %cst_16 [0] : vector<32x128xf32> to vector<128xf32>
      %65 = vector.shape_cast %64 : vector<128xf32> to vector<1x128xf32>
      %66 = vector.extract_strided_slice %14 {offsets = [2, 0], sizes = [1, 128], strides = [1, 1]} : vector<8x128xf32> to vector<1x128xf32>
      %67 = vector.extract_strided_slice %16 {offsets = [2, 0], sizes = [1, 128], strides = [1, 1]} : vector<8x128xf32> to vector<1x128xf32>
      %68 = arith.cmpf olt, %67, %65 : vector<1x128xf32>
      %69 = arith.extui %68 : vector<1x128xi1> to vector<1x128xi32>
      %70 = arith.sitofp %69 : vector<1x128xi32> to vector<1x128xf32>
      %cst_17 = arith.constant 0.000000e+00 : f32
      %71 = vector.broadcast %cst_17 : f32 to vector<1x128xf32>
      %72 = arith.cmpf olt, %66, %71 : vector<1x128xf32>
      %73 = arith.select %72, %70, %66 : vector<1x128xi1>, vector<1x128xf32>
      %74 = vector.extract_strided_slice %12 {offsets = [0, 2], sizes = [32, 1], strides = [1, 1]} : vector<32x8xf32> to vector<32x1xf32>
      %75 = vector.broadcast %74 : vector<32x1xf32> to vector<32x128xf32>
      %76 = vector.broadcast %73 : vector<1x128xf32> to vector<32x128xf32>
      %77 = arith.mulf %75, %76 : vector<32x128xf32>
      %78 = arith.addf %58, %77 : vector<32x128xf32>
      %cst_18 = arith.constant 0.000000e+00 : f32
      %79 = vector.broadcast %cst_18 : f32 to vector<32x128xf32>
      %80 = arith.maximumf %78, %79 : vector<32x128xf32>
      %81 = vector.extract_strided_slice %9 {offsets = [0, 3], sizes = [32, 1], strides = [1, 1]} : vector<32x8xf32> to vector<32x1xf32>
      %82 = vector.broadcast %81 : vector<32x1xf32> to vector<32x128xf32>
      %83 = arith.mulf %80, %82 : vector<32x128xf32>
      %cst_19 = arith.constant dense<0.000000e+00> : vector<128xf32>
      %84 = vector.multi_reduction <add>, %83, %cst_19 [0] : vector<32x128xf32> to vector<128xf32>
      %85 = vector.shape_cast %84 : vector<128xf32> to vector<1x128xf32>
      %86 = vector.extract_strided_slice %14 {offsets = [3, 0], sizes = [1, 128], strides = [1, 1]} : vector<8x128xf32> to vector<1x128xf32>
      %87 = vector.extract_strided_slice %16 {offsets = [3, 0], sizes = [1, 128], strides = [1, 1]} : vector<8x128xf32> to vector<1x128xf32>
      %88 = arith.cmpf olt, %87, %85 : vector<1x128xf32>
      %89 = arith.extui %88 : vector<1x128xi1> to vector<1x128xi32>
      %90 = arith.sitofp %89 : vector<1x128xi32> to vector<1x128xf32>
      %cst_20 = arith.constant 0.000000e+00 : f32
      %91 = vector.broadcast %cst_20 : f32 to vector<1x128xf32>
      %92 = arith.cmpf olt, %86, %91 : vector<1x128xf32>
      %93 = arith.select %92, %90, %86 : vector<1x128xi1>, vector<1x128xf32>
      %94 = vector.extract_strided_slice %12 {offsets = [0, 3], sizes = [32, 1], strides = [1, 1]} : vector<32x8xf32> to vector<32x1xf32>
      %95 = vector.broadcast %94 : vector<32x1xf32> to vector<32x128xf32>
      %96 = vector.broadcast %93 : vector<1x128xf32> to vector<32x128xf32>
      %97 = arith.mulf %95, %96 : vector<32x128xf32>
      %98 = arith.addf %78, %97 : vector<32x128xf32>
      %cst_21 = arith.constant 0.000000e+00 : f32
      %99 = vector.broadcast %cst_21 : f32 to vector<32x128xf32>
      %100 = arith.maximumf %98, %99 : vector<32x128xf32>
      %101 = vector.extract_strided_slice %9 {offsets = [0, 4], sizes = [32, 1], strides = [1, 1]} : vector<32x8xf32> to vector<32x1xf32>
      %102 = vector.broadcast %101 : vector<32x1xf32> to vector<32x128xf32>
      %103 = arith.mulf %100, %102 : vector<32x128xf32>
      %cst_22 = arith.constant dense<0.000000e+00> : vector<128xf32>
      %104 = vector.multi_reduction <add>, %103, %cst_22 [0] : vector<32x128xf32> to vector<128xf32>
      %105 = vector.shape_cast %104 : vector<128xf32> to vector<1x128xf32>
      %106 = vector.extract_strided_slice %14 {offsets = [4, 0], sizes = [1, 128], strides = [1, 1]} : vector<8x128xf32> to vector<1x128xf32>
      %107 = vector.extract_strided_slice %16 {offsets = [4, 0], sizes = [1, 128], strides = [1, 1]} : vector<8x128xf32> to vector<1x128xf32>
      %108 = arith.cmpf olt, %107, %105 : vector<1x128xf32>
      %109 = arith.extui %108 : vector<1x128xi1> to vector<1x128xi32>
      %110 = arith.sitofp %109 : vector<1x128xi32> to vector<1x128xf32>
      %cst_23 = arith.constant 0.000000e+00 : f32
      %111 = vector.broadcast %cst_23 : f32 to vector<1x128xf32>
      %112 = arith.cmpf olt, %106, %111 : vector<1x128xf32>
      %113 = arith.select %112, %110, %106 : vector<1x128xi1>, vector<1x128xf32>
      %114 = vector.extract_strided_slice %12 {offsets = [0, 4], sizes = [32, 1], strides = [1, 1]} : vector<32x8xf32> to vector<32x1xf32>
      %115 = vector.broadcast %114 : vector<32x1xf32> to vector<32x128xf32>
      %116 = vector.broadcast %113 : vector<1x128xf32> to vector<32x128xf32>
      %117 = arith.mulf %115, %116 : vector<32x128xf32>
      %118 = arith.addf %98, %117 : vector<32x128xf32>
      %cst_24 = arith.constant 0.000000e+00 : f32
      %119 = vector.broadcast %cst_24 : f32 to vector<32x128xf32>
      %120 = arith.maximumf %118, %119 : vector<32x128xf32>
      %121 = vector.extract_strided_slice %9 {offsets = [0, 5], sizes = [32, 1], strides = [1, 1]} : vector<32x8xf32> to vector<32x1xf32>
      %122 = vector.broadcast %121 : vector<32x1xf32> to vector<32x128xf32>
      %123 = arith.mulf %120, %122 : vector<32x128xf32>
      %cst_25 = arith.constant dense<0.000000e+00> : vector<128xf32>
      %124 = vector.multi_reduction <add>, %123, %cst_25 [0] : vector<32x128xf32> to vector<128xf32>
      %125 = vector.shape_cast %124 : vector<128xf32> to vector<1x128xf32>
      %126 = vector.extract_strided_slice %14 {offsets = [5, 0], sizes = [1, 128], strides = [1, 1]} : vector<8x128xf32> to vector<1x128xf32>
      %127 = vector.extract_strided_slice %16 {offsets = [5, 0], sizes = [1, 128], strides = [1, 1]} : vector<8x128xf32> to vector<1x128xf32>
      %128 = arith.cmpf olt, %127, %125 : vector<1x128xf32>
      %129 = arith.extui %128 : vector<1x128xi1> to vector<1x128xi32>
      %130 = arith.sitofp %129 : vector<1x128xi32> to vector<1x128xf32>
      %cst_26 = arith.constant 0.000000e+00 : f32
      %131 = vector.broadcast %cst_26 : f32 to vector<1x128xf32>
      %132 = arith.cmpf olt, %126, %131 : vector<1x128xf32>
      %133 = arith.select %132, %130, %126 : vector<1x128xi1>, vector<1x128xf32>
      %134 = vector.extract_strided_slice %12 {offsets = [0, 5], sizes = [32, 1], strides = [1, 1]} : vector<32x8xf32> to vector<32x1xf32>
      %135 = vector.broadcast %134 : vector<32x1xf32> to vector<32x128xf32>
      %136 = vector.broadcast %133 : vector<1x128xf32> to vector<32x128xf32>
      %137 = arith.mulf %135, %136 : vector<32x128xf32>
      %138 = arith.addf %118, %137 : vector<32x128xf32>
      %cst_27 = arith.constant 0.000000e+00 : f32
      %139 = vector.broadcast %cst_27 : f32 to vector<32x128xf32>
      %140 = arith.maximumf %138, %139 : vector<32x128xf32>
      %141 = vector.extract_strided_slice %9 {offsets = [0, 6], sizes = [32, 1], strides = [1, 1]} : vector<32x8xf32> to vector<32x1xf32>
      %142 = vector.broadcast %141 : vector<32x1xf32> to vector<32x128xf32>
      %143 = arith.mulf %140, %142 : vector<32x128xf32>
      %cst_28 = arith.constant dense<0.000000e+00> : vector<128xf32>
      %144 = vector.multi_reduction <add>, %143, %cst_28 [0] : vector<32x128xf32> to vector<128xf32>
      %145 = vector.shape_cast %144 : vector<128xf32> to vector<1x128xf32>
      %146 = vector.extract_strided_slice %14 {offsets = [6, 0], sizes = [1, 128], strides = [1, 1]} : vector<8x128xf32> to vector<1x128xf32>
      %147 = vector.extract_strided_slice %16 {offsets = [6, 0], sizes = [1, 128], strides = [1, 1]} : vector<8x128xf32> to vector<1x128xf32>
      %148 = arith.cmpf olt, %147, %145 : vector<1x128xf32>
      %149 = arith.extui %148 : vector<1x128xi1> to vector<1x128xi32>
      %150 = arith.sitofp %149 : vector<1x128xi32> to vector<1x128xf32>
      %cst_29 = arith.constant 0.000000e+00 : f32
      %151 = vector.broadcast %cst_29 : f32 to vector<1x128xf32>
      %152 = arith.cmpf olt, %146, %151 : vector<1x128xf32>
      %153 = arith.select %152, %150, %146 : vector<1x128xi1>, vector<1x128xf32>
      %154 = vector.extract_strided_slice %12 {offsets = [0, 6], sizes = [32, 1], strides = [1, 1]} : vector<32x8xf32> to vector<32x1xf32>
      %155 = vector.broadcast %154 : vector<32x1xf32> to vector<32x128xf32>
      %156 = vector.broadcast %153 : vector<1x128xf32> to vector<32x128xf32>
      %157 = arith.mulf %155, %156 : vector<32x128xf32>
      %158 = arith.addf %138, %157 : vector<32x128xf32>
      %cst_30 = arith.constant 0.000000e+00 : f32
      %159 = vector.broadcast %cst_30 : f32 to vector<32x128xf32>
      %160 = arith.maximumf %158, %159 : vector<32x128xf32>
      %161 = vector.extract_strided_slice %9 {offsets = [0, 7], sizes = [32, 1], strides = [1, 1]} : vector<32x8xf32> to vector<32x1xf32>
      %162 = vector.broadcast %161 : vector<32x1xf32> to vector<32x128xf32>
      %163 = arith.mulf %160, %162 : vector<32x128xf32>
      %cst_31 = arith.constant dense<0.000000e+00> : vector<128xf32>
      %164 = vector.multi_reduction <add>, %163, %cst_31 [0] : vector<32x128xf32> to vector<128xf32>
      %165 = vector.shape_cast %164 : vector<128xf32> to vector<1x128xf32>
      %166 = vector.extract_strided_slice %14 {offsets = [7, 0], sizes = [1, 128], strides = [1, 1]} : vector<8x128xf32> to vector<1x128xf32>
      %167 = vector.extract_strided_slice %16 {offsets = [7, 0], sizes = [1, 128], strides = [1, 1]} : vector<8x128xf32> to vector<1x128xf32>
      %168 = arith.cmpf olt, %167, %165 : vector<1x128xf32>
      %169 = arith.extui %168 : vector<1x128xi1> to vector<1x128xi32>
      %170 = arith.sitofp %169 : vector<1x128xi32> to vector<1x128xf32>
      %cst_32 = arith.constant 0.000000e+00 : f32
      %171 = vector.broadcast %cst_32 : f32 to vector<1x128xf32>
      %172 = arith.cmpf olt, %166, %171 : vector<1x128xf32>
      %173 = arith.select %172, %170, %166 : vector<1x128xi1>, vector<1x128xf32>
      %174 = vector.extract_strided_slice %12 {offsets = [0, 7], sizes = [32, 1], strides = [1, 1]} : vector<32x8xf32> to vector<32x1xf32>
      %175 = vector.broadcast %174 : vector<32x1xf32> to vector<32x128xf32>
      %176 = vector.broadcast %173 : vector<1x128xf32> to vector<32x128xf32>
      %177 = arith.mulf %175, %176 : vector<32x128xf32>
      %178 = arith.addf %158, %177 : vector<32x128xf32>
      %179 = tpu.concatenate %25, %45, %65, %85, %105, %125, %145, %165 in 0 : vector<1x128xf32>, vector<1x128xf32>, vector<1x128xf32>, vector<1x128xf32>, vector<1x128xf32>, vector<1x128xf32>, vector<1x128xf32>, vector<1x128xf32> -> vector<8x128xf32>
      %180 = vector.broadcast %18 : vector<8x1xf32> to vector<8x128xf32>
      %181 = arith.addf %179, %180 : vector<8x128xf32>
      %182 = arith.negf %181 : vector<8x128xf32>
      %183 = math.exp %182 : vector<8x128xf32>
      %cst_33 = arith.constant 1.000000e+00 : f32
      %184 = vector.broadcast %cst_33 : f32 to vector<8x128xf32>
      %185 = arith.addf %184, %183 : vector<8x128xf32>
      %186 = arith.divf %184, %185 : vector<8x128xf32>
      %187 = arith.index_cast %6 : i32 to index
      %c0_34 = arith.constant 0 : index
      %188 = vector.load %arg7[%187, %c0_34] : memref<64x128xf32, #tpu.memory_space<vmem>>, vector<8x128xf32>
      tpu.vector_store %arg7[%187, %c0_34], %186 {strides = array<i32>} : memref<64x128xf32, #tpu.memory_space<vmem>>, vector<8x128xf32>,
      scf.yield %178 : vector<32x128xf32>
    }
    %c8_i32_1 = arith.constant 8 : i32
    return
  }
  func.func @transform_0(%arg0: i32) -> (i32, i32) {
    %c0_i32 = arith.constant 0 : i32
    %c0_i32_0 = arith.constant 0 : i32
    return %c0_i32, %arg0 : i32, i32
  }
  func.func @transform_1(%arg0: i32) -> (i32, i32) {
    %c0_i32 = arith.constant 0 : i32
    %c0_i32_0 = arith.constant 0 : i32
    return %c0_i32, %arg0 : i32, i32
  }
  func.func @transform_2(%arg0: i32) -> (i32, i32, i32) {
    %c0_i32 = arith.constant 0 : i32
    %c0_i32_0 = arith.constant 0 : i32
    %c0_i32_1 = arith.constant 0 : i32
    %c0_i32_2 = arith.constant 0 : i32
    return %c0_i32, %c0_i32_0, %c0_i32_1 : i32, i32, i32
  }
  func.func @transform_3(%arg0: i32) -> (i32, i32, i32) {
    %c0_i32 = arith.constant 0 : i32
    %c0_i32_0 = arith.constant 0 : i32
    %c0_i32_1 = arith.constant 0 : i32
    %c0_i32_2 = arith.constant 0 : i32
    return %c0_i32, %c0_i32_0, %c0_i32_1 : i32, i32, i32
  }
  func.func @transform_4(%arg0: i32) -> (i32, i32) {
    %c0_i32 = arith.constant 0 : i32
    %c0_i32_0 = arith.constant 0 : i32
    %c0_i32_1 = arith.constant 0 : i32
    return %c0_i32, %c0_i32_0 : i32, i32
  }
  func.func @transform_5(%arg0: i32) -> (i32, i32) {
    %c0_i32 = arith.constant 0 : i32
    %c0_i32_0 = arith.constant 0 : i32
    %c0_i32_1 = arith.constant 0 : i32
    return %c0_i32, %c0_i32_0 : i32, i32
  }
  func.func @transform_6(%arg0: i32) -> (i32, i32) {
    %c0_i32 = arith.constant 0 : i32
    %c0_i32_0 = arith.constant 0 : i32
    return %c0_i32, %arg0 : i32, i32
  }
}

</mosaic_0001>

<bundles_post_ra>
// kernel: tpu_custom_call.1
= control target key start
LH: loop header
LB: loop body
LE: loop exit
PB: predicated region body
PF: predicated region fallthrough
CT: control target
= control target key end

     0   :  { %11 = vsyncpa [#allocation5], 0  ;;  %s1784_s0 = inlined_call_operand.vmem [shape: f32[64,256], index: 0, kind: input, shape index: {}]   ;;  %s1785_s1 = inlined_call_operand.vmem [shape: f32[64,256], index: 1, kind: input, shape index: {}]   ;;  %s1786_s2 = inlined_call_operand.vmem [shape: f32[8,32,8], index: 2, kind: input, shape index: {}]   ;;  %s1787_s3 = inlined_call_operand.vmem [shape: f32[8,32,8], index: 3, kind: input, shape index: {}]   ;;  %s1788_s4 = inlined_call_operand.vmem [shape: f32[32,1], index: 4, kind: input, shape index: {}]   ;;  %s1789_s5 = inlined_call_operand.vmem [shape: f32[64,1], index: 5, kind: input, shape index: {}]   ;;  %s1790_s6 = inlined_call_operand.hbm [shape: f32[64,256], index: 6, kind: output, shape index: {}]  }
   0x1   :  { %13 = vsyncpa [#allocation5 + $0x1], 0  ;;  %s1427_s21 = smov 0   ;;  %s1429_s22 = smov 0  }
   0x2   :  { %s1431_s23 = smov 0   ;;  %s1433_s24 = smov 0  }
   0x3 LB: > { %s1130_s25 = sadd.s32 4294967295, %s1356_s24   ;;  %s1131_s26 = sadd.s32 4294967294, %s1356_s24   ;;  %s1356_s24 = sphi %s1433_s24, %s1797_s24   ;;  %s1352_s23 = sphi %s1431_s23, %s1796_s23   ;;  %s1348_s22 = sphi %s1429_s22, %s1795_s22   ;;  %s1344_s21 = sphi %s1427_s21, %s1794_s21  }
   0x4   : > { %s1450_s27 = sadd.s32 1, %s1356_s24   ;;  %s26_s28 = sadd.s32 1, %s1352_s23 }
   0x5   : > { %s23_s29 = ssub.s32 %s1356_s24, %s1450_s27  ;;  %p33_p0 = scmp.ne.s32.totalorder %s1352_s23, %s1348_s22 }
   0x6   : > { %p24_p1 = scmp.eq.s32.totalorder %s23_s29, 0  ;;  %p34_p2 = scmp.eq.s32.totalorder %s1356_s24, 0 }
   0x7   : > { %p173_p3 = scmp.eq.s32.totalorder %s1130_s25, 1  ;;  %p178_p4 = scmp.ne.s32.totalorder %s1348_s22, %s1344_s21 }
   0x8   : > { %s1463_s30 = scalar_select %p24_p1, %s1352_s23, %s26_s28  }
   0x9   : > { %p1465_p5 = por %p34_p2, %p33_p0  ;;  %p1469_p6 = por %p173_p3, %p33_p0 }
   0xa   : > { %p179_p7 = scmp.eq.s32.totalorder %s1131_s26, 1  ;;  %p1133_p9 = scmp.ge.s32.totalorder %s1356_s24, 2 }
   0xc   : > { %p1473_p8 = por %p179_p7, %p178_p4  ;;  %207 = sbr.rel (%p1133_p9) target bundleno = 35 (0x23), region = 32 }
  0x13   : > { %210 = sbr.rel (!%p1465_p5) target bundleno = 27 (0x1b), region = 36  ;;  %s212_s10 = sand.u32 (%p1465_p5), 1, %s1352_s23  }
  0x14   : > { %s1135_s11 = sshll.u32 (%p1465_p5), %s1356_s24, 3  ;;  %s1134_s12 = sshll.u32 (%p1465_p5), %s212_s10, 6 }
  0x15   : > { %s216_s15 = scalar_lea.vmem (%p1465_p5), %s1784_s0, %s1135_s11  ;;  %s214_s16 = scalar_lea.vmem (%p1465_p5), [#allocation2], %s1134_s12 }
  0x16   : > { %v258_v0 = vld [vmem:[%s216_s15] sm:$0xff] (%p1465_p5)  ;;  %v260_v1 = vld [vmem:[%s216_s15 + $0x10] sm:$0xff] (%p1465_p5) }
  0x17   : > { %v262_v2 = vld [vmem:[%s216_s15 + $0x20] sm:$0xff] (%p1465_p5)  ;;  %259 = vst [vmem:[%s214_s16] sm:$0xff] (%p1465_p5), %v258_v0  ;;  %261 = vst [vmem:[%s214_s16 + $0x8] sm:$0xff] (%p1465_p5), %v260_v1  ;;  %v264_v3 = vld [vmem:[%s216_s15 + $0x30] sm:$0xff] (%p1465_p5) }
  0x18   : > { %263 = vst [vmem:[%s214_s16 + $0x10] sm:$0xff] (%p1465_p5), %v262_v2  ;;  %v266_v4 = vld [vmem:[%s216_s15 + $0x40] sm:$0xff] (%p1465_p5)  ;;  %v268_v5 = vld [vmem:[%s216_s15 + $0x50] sm:$0xff] (%p1465_p5)  ;;  %265 = vst [vmem:[%s214_s16 + $0x18] sm:$0xff] (%p1465_p5), %v264_v3 }
  0x19   : > { %267 = vst [vmem:[%s214_s16 + $0x20] sm:$0xff] (%p1465_p5), %v266_v4  ;;  %269 = vst [vmem:[%s214_s16 + $0x28] sm:$0xff] (%p1465_p5), %v268_v5  ;;  %v270_v6 = vld [vmem:[%s216_s15 + $0x60] sm:$0xff] (%p1465_p5)  ;;  %v272_v7 = vld [vmem:[%s216_s15 + $0x70] sm:$0xff] (%p1465_p5) }
  0x1a   : > { %271 = vst [vmem:[%s214_s16 + $0x30] sm:$0xff] %v270_v6  ;;  %273 = vst [vmem:[%s214_s16 + $0x38] sm:$0xff] %v272_v7 }
  0x1b PF: > { %279 = sbr.rel (!%p1465_p5) target bundleno = 35 (0x23), region = 74  ;;  %s281_s17 = sand.u32 (%p1465_p5), 1, %s1352_s23  }
  0x1c   : > { %s1137_s18 = sshll.u32 (%p1465_p5), %s1356_s24, 3  ;;  %s1136_s19 = sshll.u32 (%p1465_p5), %s281_s17, 6 }
  0x1d   : > { %s285_s28 = scalar_lea.vmem (%p1465_p5), %s1785_s1, %s1137_s18  ;;  %s283_s29 = scalar_lea.vmem (%p1465_p5), [#allocation3], %s1136_s19 }
  0x1e   : > { %v327_v8 = vld [vmem:[%s285_s28] sm:$0xff] (%p1465_p5)  ;;  %v329_v9 = vld [vmem:[%s285_s28 + $0x10] sm:$0xff] (%p1465_p5) }
  0x1f   : > { %v331_v10 = vld [vmem:[%s285_s28 + $0x20] sm:$0xff] (%p1465_p5)  ;;  %328 = vst [vmem:[%s283_s29] sm:$0xff] (%p1465_p5), %v327_v8  ;;  %330 = vst [vmem:[%s283_s29 + $0x8] sm:$0xff] (%p1465_p5), %v329_v9  ;;  %v333_v11 = vld [vmem:[%s285_s28 + $0x30] sm:$0xff] (%p1465_p5) }
  0x20   : > { %332 = vst [vmem:[%s283_s29 + $0x10] sm:$0xff] (%p1465_p5), %v331_v10  ;;  %v335_v12 = vld [vmem:[%s285_s28 + $0x40] sm:$0xff] (%p1465_p5)  ;;  %v337_v13 = vld [vmem:[%s285_s28 + $0x50] sm:$0xff] (%p1465_p5)  ;;  %334 = vst [vmem:[%s283_s29 + $0x18] sm:$0xff] (%p1465_p5), %v333_v11 }
  0x21   : > { %336 = vst [vmem:[%s283_s29 + $0x20] sm:$0xff] (%p1465_p5), %v335_v12  ;;  %338 = vst [vmem:[%s283_s29 + $0x28] sm:$0xff] (%p1465_p5), %v337_v13  ;;  %v339_v14 = vld [vmem:[%s285_s28 + $0x60] sm:$0xff] (%p1465_p5)  ;;  %v341_v15 = vld [vmem:[%s285_s28 + $0x70] sm:$0xff] (%p1465_p5) }
  0x22   : > { %340 = vst [vmem:[%s283_s29 + $0x30] sm:$0xff] %v339_v14  ;;  %342 = vst [vmem:[%s283_s29 + $0x38] sm:$0xff] %v341_v15 }
  0x23 PF: > { %p1138_p10 = scmp.ge.s32.totalorder %s1356_s24, 1  ;;  %p347_p11 = scmp.lt.s32.totalorder %s1356_s24, 3 }
  0x25   : > { %p348_p12 = pnand %p1138_p10, %p347_p11 }
  0x26   : > { %v396_v16 = vld [vmem:[%s1788_s4 + $0x10] sm:$0xff] (!%p348_p12)  ;;  %v394_v17 = vld [vmem:[%s1788_s4] sm:$0xff] (!%p348_p12)  ;;  %v1378_v18 = vmov (!%p348_p12), 0   ;;  %v397_v19 = vld [vmem:[%s1788_s4 + $0x18] sm:$0xff] (!%p348_p12)  ;;  %s354_s17 = sand.u32 (!%p348_p12), 1, %s1348_s22   ;;  %s1524_s28 = smov (!%p348_p12), 0  }
  0x27   : > { %351 = sbr.rel (%p348_p12) target bundleno = 589 (0x24d), region = 112  ;;  %1250 = vset.pattern.permute.xlu1 (!%p348_p12), %v1378_v18  ;;  %1249 = vset.pattern.permute.xlu0 (!%p348_p12), %v1378_v18  ;;  %v395_v20 = vld [vmem:[%s1788_s4 + $0x8] sm:$0xff] (!%p348_p12)  ;;  %s1511_s18 = sshll.u32 (!%p348_p12), %s354_s17, 6 }
  0x28   : > { %410 = vperm.xlu1 (!%p348_p12), %1250, %v396_v16   ;;  %400 = vperm.xlu0 (!%p348_p12), %1249, %v394_v17   ;;  %s356_s19 = scalar_lea.vmem (!%p348_p12), [#allocation2], %s1511_s18  ;;  %s363_s20 = scalar_lea.vmem (!%p348_p12), [#allocation3], %s1511_s18 }
  0x29   : > { %s393_s26 = scalar_lea.vmem (!%p348_p12), [#allocation4], %s1511_s18 }
  0x2c   : > { %415 = vperm.xlu1 (!%p348_p12), %1250, %v397_v19   ;;  %405 = vperm.xlu0 (!%p348_p12), %1249, %v395_v20  }
  0xa7   : > { %v411_v21 = vpop.permute.xlu1 %410   ;;  %v401_v22 = vpop.permute.xlu0 %400  }
  0xab   : > { %v416_v23 = vpop.permute.xlu1 %415   ;;  %v406_v24 = vpop.permute.xlu0 %405  }
  0xac LB: >> { %v1379_v25 = vmov 0   ;;  %s1143_s29 = sshll.u32 %s1376_s28, 5  ;;  %v1380_v34 = vmov 1   ;;  %v1381_v35 = vmov 2   ;;  %v1382_v36 = vmov 3   ;;  %s1633_s15 = sshll.u32 %s1376_s28, 3  ;;  %s1376_s28 = sphi %s1524_s28, %s423_s28   ;;  %v1372_v22 = vphi %v401_v22, %v971_v22   ;;  %v1368_v24 = vphi %v406_v24, %v972_v24   ;;  %v1364_v21 = vphi %v411_v21, %v973_v21   ;;  %v1360_v23 = vphi %v416_v23, %v974_v23  }
  0xad   : >> { %1252 = vset.pattern.permute.xlu1 %v1379_v25  ;;  %1251 = vset.pattern.permute.xlu0 %v1379_v25  ;;  %s430_s11 = scalar_lea.vmem %s1786_s2, %s1143_s29  ;;  %s435_s14 = scalar_lea.vmem %s1787_s3, %s1143_s29  ;;  %v1383_v37 = vmov 4   ;;  %v1384_v38 = vmov 5   ;;  %v1385_v39 = vmov 6   ;;  %v1386_v40 = vmov 7  }
  0xae   : >> { %v1547_v26 = vld [vmem:[%s430_s11 + $0x10] sm:$0xff]  ;;  %v1549_v27 = vld [vmem:[%s430_s11] sm:$0xff]  ;;  %v1553_v28 = vld [vmem:[%s430_s11 + $0x18] sm:$0xff]  ;;  %v446_v43 = vmax.f32 %v1372_v22, 0.0  ;;  %v447_v44 = vmax.f32 %v1368_v24, 0.0  ;;  %v448_v45 = vmax.f32 %v1364_v21, 0.0  ;;  %s444_s7 = scalar_lea.vmem %s1789_s5, %s1633_s15  ;;  %v508_v59 = vlaneseq  ;;  %s440_s10 = scalar_lea.vmem %s356_s19, %s1633_s15 [#allocation2] }
  0xaf   : >> { %462 = vperm.xlu1 %1252, %v1547_v26   ;;  %452 = vperm.xlu0 %1251, %v1549_v27   ;;  %v1555_v29 = vld [vmem:[%s430_s11 + $0x8] sm:$0xff]  ;;  %v1564_v31 = vld [vmem:[%s435_s14] sm:$0xff]  ;;  %v1568_v32 = vld [vmem:[%s435_s14 + $0x18] sm:$0xff]  ;;  %v449_v48 = vmax.f32 %v1360_v23, 0.0  ;;  %s442_s11 = scalar_lea.vmem %s363_s20, %s1633_s15 [#allocation3]  ;;  %v1387_v6 = vmov 0.0   ;;  %vm975_vm2 = vcmask 1040384   ;;  %s1001_s12 = scalar_lea.vmem %s393_s26, %s1633_s15 [#allocation4] }
  0xb0   : >> { %v1562_v30 = vld [vmem:[%s435_s14 + $0x8] sm:$0xff]  ;;  %v1570_v33 = vld [vmem:[%s435_s14 + $0x10] sm:$0xff]  ;;  %v445_v55 = vld [vmem:[%s444_s7] sm:$0xff]  ;;  %v1648_v62 = vshrl.u32 %v508_v59, 7  ;;  %vm977_vm4 = vcmask 1041408   ;;  %vm979_vm6 = vcmask 1042432  }
  0xb1   : >> { %v1650_v63 = vld [vmem:[%s440_s10] sm:$0xff]  ;;  %vm981_vm8 = vcmask 1043456   ;;  %vm983_vm12 = vcmask 1044480   ;;  %vm985_vm13 = vcmask 1045504   ;;  %vm987_vm14 = vcmask 1046528   ;;  %s423_s28 = sadd.s32 1, %s1376_s28  }
  0xb2   : >> { %v1652_v2 = vld [vmem:[%s442_s11] sm:$0xff]  ;;  %vm486_vm0 = vcmp.lt.f32.partialorder %v1650_v63, 0.0  ;;  %v510_v5 = vsub.s32 0, %v1648_v62  ;;  %p420_p13 = scmp.ge.s32.totalorder %s423_s28, 8  }
  0xb3   : >> { %467 = vperm.xlu1 %1252, %v1553_v28   ;;  %457 = vperm.xlu0 %1251, %v1555_v29   ;;  %s1154_s13 = sshll.u32 (%p420_p13), %s1130_s25, 7  ;;  %s1016_s29 = sshll.u32 (%p420_p13), %s393_s26, 4  ;;  %s1738_s29 = int_to_ptr.vmem [resolvable:$true] %s1016_s29 }
  0xb4   : > { %s1734_s16 = scalar_lea.hbm (%p420_p13), %s1790_s6, %s1154_s13  ;;  %s1742_s28 = scalar_lea.sflag (%p420_p13), [#allocation5], %s354_s17 }
  0xb5   : > { %s1274_s19 = scalar_lea.vmem (%p420_p13), %s1738_s29, 1024  ;;  %s1388_s25 = smov (%p420_p13), [#allocation4]  }
  0xb6   : > { %p1275_p0 = scmp.ne.s32.totalorder (%p420_p13), %s1738_s29, %s1274_s19  ;;  %s1278_s20 = sshll.u32 (%p420_p13), %s1388_s25, 4  ;;  %s1279_s20 = int_to_ptr.vmem [resolvable:$false] %s1278_s20 }
  0xb7   : >> { %495 = vperm.xlu1 %1252, %v1562_v30   ;;  %490 = vperm.xlu0 %1251, %v1564_v31   ;;  %s1280_s7 = scalar_lea.vmem (%p420_p13), %s1279_s20, 2048  ;;  %p1281_p3 = scmp.lt.s32.totalorder (%p420_p13), %s1738_s29, %s1279_s20 }
  0xb8   : > { %p1276_p1 = pnand (%p420_p13), %p1275_p0, %p1469_p6  ;;  %p1282_p4 = scmp.lt.s32.totalorder (%p420_p13), %s1280_s7, %s1274_s19 }
  0xba   : > { %p1277_p2 = pneg (%p420_p13), %p1276_p1  ;;  %p1283_p5 = por (%p420_p13), %p1282_p4, %p1281_p3 }
  0xbb   : >> { %505 = vperm.xlu1 %1252, %v1568_v32   ;;  %500 = vperm.xlu0 %1251, %v1570_v33  }
  0xbc   : > { %p1284_p7 = pnand (%p420_p13), %p1283_p5, %p1277_p2 }
  0xbf   : >> { %1254 = vset.pattern.permute.xlu1 %v1380_v34  ;;  %1253 = vset.pattern.permute.xlu0 %v1380_v34 }
  0xc0   : >> { %529 = vperm.xlu1 %1254, %v1555_v29   ;;  %525 = vperm.xlu0 %1253, %v1549_v27  }
  0xc4   : >> { %533 = vperm.xlu1 %1254, %v1547_v26   ;;  %537 = vperm.xlu0 %1253, %v1553_v28  }
  0xc8   : >> { %558 = vperm.xlu1 %1254, %v1564_v31   ;;  %562 = vperm.xlu0 %1253, %v1562_v30  }
  0xcc   : >> { %566 = vperm.xlu1 %1254, %v1570_v33   ;;  %570 = vperm.xlu0 %1253, %v1568_v32  }
  0xd0   : >> { %1255 = vset.pattern.permute.xlu1 %v1381_v35  ;;  %1256 = vset.pattern.permute.xlu0 %v1381_v35 }
  0xd1   : >> { %590 = vperm.xlu1 %1255, %v1549_v27   ;;  %594 = vperm.xlu0 %1256, %v1555_v29  }
  0xd5   : >> { %598 = vperm.xlu1 %1255, %v1547_v26   ;;  %623 = vperm.xlu0 %1256, %v1564_v31  }
  0xd9   : >> { %602 = vperm.xlu1 %1255, %v1553_v28   ;;  %631 = vperm.xlu0 %1256, %v1570_v33  }
  0xdd   : >> { %627 = vperm.xlu1 %1255, %v1562_v30   ;;  %1257 = vset.pattern.permute.xlu0 %v1382_v36 }
  0xde   : >> { %655 = vperm.xlu0 %1257, %v1549_v27  }
  0xe1   : >> { %635 = vperm.xlu1 %1255, %v1568_v32  }
  0xe2   : >> { %667 = vperm.xlu0 %1257, %v1553_v28  }
  0xe5   : >> { %1258 = vset.pattern.permute.xlu1 %v1382_v36 }
  0xe6   : >> { %659 = vperm.xlu1 %1258, %v1555_v29   ;;  %692 = vperm.xlu0 %1257, %v1562_v30  }
  0xea   : >> { %663 = vperm.xlu1 %1258, %v1547_v26   ;;  %700 = vperm.xlu0 %1257, %v1568_v32  }
  0xee   : >> { %688 = vperm.xlu1 %1258, %v1564_v31   ;;  %1260 = vset.pattern.permute.xlu0 %v1383_v37 }
  0xef   : >> { %724 = vperm.xlu0 %1260, %v1555_v29  }
  0xf2   : >> { %696 = vperm.xlu1 %1258, %v1570_v33  }
  0xf3   : >> { %753 = vperm.xlu0 %1260, %v1564_v31  }
  0xf6   : >> { %1259 = vset.pattern.permute.xlu1 %v1383_v37 }
  0xf7   : >> { %720 = vperm.xlu1 %1259, %v1549_v27   ;;  %761 = vperm.xlu0 %1260, %v1570_v33  }
  0xfb   : >> { %728 = vperm.xlu1 %1259, %v1547_v26   ;;  %1261 = vset.pattern.permute.xlu0 %v1384_v38 }
  0xfc   : >> { %785 = vperm.xlu0 %1261, %v1549_v27  }
  0xff   : >> { %732 = vperm.xlu1 %1259, %v1553_v28  }
 0x100   : >> { %797 = vperm.xlu0 %1261, %v1553_v28  }
 0x103   : >> { %757 = vperm.xlu1 %1259, %v1562_v30  }
 0x104   : >> { %822 = vperm.xlu0 %1261, %v1562_v30  }
 0x107   : >> { %765 = vperm.xlu1 %1259, %v1568_v32  }
 0x108   : >> { %830 = vperm.xlu0 %1261, %v1568_v32  }
 0x10b   : >> { %1262 = vset.pattern.permute.xlu1 %v1384_v38 }
 0x10c   : >> { %789 = vperm.xlu1 %1262, %v1555_v29   ;;  %1264 = vset.pattern.permute.xlu0 %v1385_v39 }
 0x10d   : >> { %854 = vperm.xlu0 %1264, %v1555_v29  }
 0x110   : >> { %793 = vperm.xlu1 %1262, %v1547_v26  }
 0x111   : >> { %883 = vperm.xlu0 %1264, %v1564_v31  }
 0x114   : >> { %818 = vperm.xlu1 %1262, %v1564_v31  }
 0x115   : >> { %891 = vperm.xlu0 %1264, %v1570_v33  }
 0x118   : >> { %826 = vperm.xlu1 %1262, %v1570_v33  }
 0x119   : >> { %1265 = vset.pattern.permute.xlu0 %v1386_v40 }
 0x11a   : >> { %915 = vperm.xlu0 %1265, %v1549_v27  }
 0x11c   : >> { %1263 = vset.pattern.permute.xlu1 %v1385_v39 }
 0x11d   : >> { %850 = vperm.xlu1 %1263, %v1549_v27  }
 0x11e   : >> { %927 = vperm.xlu0 %1265, %v1553_v28  }
 0x121   : >> { %858 = vperm.xlu1 %1263, %v1547_v26  }
 0x122   : >> { %948 = vperm.xlu0 %1265, %v1564_v31  }
 0x125   : >> { %862 = vperm.xlu1 %1263, %v1553_v28  }
 0x126   : >> { %956 = vperm.xlu0 %1265, %v1570_v33  }
 0x129   : >> { %887 = vperm.xlu1 %1263, %v1562_v30  }
 0x12a   : >> { %1269 = vset.pattern.permute.xlu0 %v1379_v25 }
 0x12d   : >> { %895 = vperm.xlu1 %1263, %v1568_v32  }
 0x12e   : >> { %v463_v41 = vpop.permute.xlu1 %462  ;;  %v453_v42 = vpop.permute.xlu0 %452 }
 0x12f   : >> { %v470_v47 = vmul.f32 %v453_v42, %v446_v43  ;;  %v472_v51 = vmul.f32 %v463_v41, %v448_v45 }
 0x131   : >> { %1266 = vset.pattern.permute.xlu1 %v1386_v40 }
 0x132   : >> { %v458_v46 = vpop.permute.xlu0 %457  ;;  %919 = vperm.xlu1 %1266, %v1555_v29   ;;  %v468_v50 = vpop.permute.xlu1 %467 }
 0x133   : >> { %v471_v49 = vmul.f32 %v458_v46, %v447_v44  ;;  %v473_v53 = vmul.f32 %v468_v50, %v449_v48  ;;  %v575_v44 = vsub.s32 1, %v1648_v62 }
 0x135   : >> { %v474_v52 = vadd.f32 %v471_v49, %v470_v47 }
 0x136   : >> { %923 = vperm.xlu1 %1266, %v1547_v26   ;;  %v496_v1 = vpop.permute.xlu1 %495  ;;  %v491_v4 = vpop.permute.xlu0 %490 }
 0x137   : >> { %v475_v54 = vadd.f32 %v474_v52, %v472_v51 }
 0x139   : >> { %v476_v56 = vadd.f32 %v475_v54, %v473_v53 }
 0x13a   : >> { %1267 = vset.pattern.permute.xlu1 %v1379_v25  ;;  %v506_v9 = vpop.permute.xlu1 %505  ;;  %v501_v11 = vpop.permute.xlu0 %500 }
 0x13b   : >> { %v477_v57 = vrot.slane %v476_v56, 4  ;;  %991 = vperm.xlu1 %1267, %v445_v55  }
 0x13d   : >> { %v478_v58 = vadd.f32 %v477_v57, %v476_v56 }
 0x13f   : >> { %v479_v60 = vrot.slane %v478_v58, 2  ;;  %1268 = vset.pattern.permute.xlu1 %v1386_v40  ;;  %v530_v16 = vpop.permute.xlu1 %529  ;;  %v526_v25 = vpop.permute.xlu0 %525 }
 0x140   : >> { %952 = vperm.xlu1 %1268, %v1562_v30  }
 0x141   : >> { %v480_v61 = vadd.f32 %v479_v60, %v478_v58 }
 0x143   : >> { %v481_v0 = vrot.slane %v480_v61, 1  ;;  %v538_v35 = vpop.permute.xlu0 %537 }
 0x144   : >> { %960 = vperm.xlu1 %1268, %v1568_v32   ;;  %v534_v32 = vpop.permute.xlu1 %533 }
 0x145   : >> { %v482_v3 = vadd.f32 %v481_v0, %v480_v61 }
 0x147   : >> { %vm483_vm1 = vcmp.lt.f32.partialorder %v1652_v2, %v482_v3  ;;  %v563_v42 = vpop.permute.xlu0 %562 }
 0x148   : >> { %v1144_v7 = vsel %vm483_vm1, 1.0, %v1387_v6 }
 0x149   : >> { %v487_v8 = vsel %vm486_vm0, %v1144_v7, %v1650_v63 }
 0x14a   : >> { %v511_v10 = vrot.slane %v487_v8, %v510_v5 }
 0x14b   : >> { %v571_v50 = vpop.permute.xlu0 %570 }
 0x14c   : >> { %v513_v12 = vmul.f32 %v511_v10, %v496_v1  ;;  %v512_v13 = vmul.f32 %v511_v10, %v491_v4  ;;  %v515_v14 = vmul.f32 %v511_v10, %v506_v9  ;;  %v514_v15 = vmul.f32 %v511_v10, %v501_v11 }
 0x14e   : >> { %v517_v17 = vadd.f32 %v1368_v24, %v513_v12  ;;  %v516_v18 = vadd.f32 %v1372_v22, %v512_v13  ;;  %v519_v19 = vadd.f32 %v1360_v23, %v515_v14  ;;  %v518_v20 = vadd.f32 %v1364_v21, %v514_v15  ;;  %v559_v23 = vpop.permute.xlu1 %558 }
 0x150   : >> { %v521_v26 = vmax.f32 %v517_v17, 0.0  ;;  %v520_v27 = vmax.f32 %v516_v18, 0.0  ;;  %v522_v28 = vmax.f32 %v518_v20, 0.0  ;;  %v523_v31 = vmax.f32 %v519_v19, 0.0  ;;  %v595_v1 = vpop.permute.xlu0 %594 }
 0x152   : >> { %v541_v29 = vmul.f32 %v530_v16, %v521_v26  ;;  %v540_v30 = vmul.f32 %v526_v25, %v520_v27  ;;  %v542_v34 = vmul.f32 %v534_v32, %v522_v28  ;;  %v543_v37 = vmul.f32 %v538_v35, %v523_v31  ;;  %v567_v43 = vpop.permute.xlu1 %566 }
 0x153   : >> { %v640_v25 = vsub.s32 2, %v1648_v62 }
 0x154   : >> { %v544_v33 = vadd.f32 %v541_v29, %v540_v30 }
 0x156   : >> { %v545_v36 = vadd.f32 %v544_v33, %v542_v34  ;;  %v591_v48 = vpop.permute.xlu1 %590 }
 0x158   : >> { %v546_v24 = vadd.f32 %v545_v36, %v543_v37 }
 0x15a   : >> { %v547_v38 = vrot.slane %v546_v24, 4  ;;  %v599_v59 = vpop.permute.xlu1 %598 }
 0x15c   : >> { %v548_v22 = vadd.f32 %v547_v38, %v546_v24 }
 0x15e   : >> { %v549_v39 = vrot.slane %v548_v22, 2  ;;  %v603_v9 = vpop.permute.xlu1 %602 }
 0x160   : >> { %v550_v40 = vadd.f32 %v549_v39, %v548_v22 }
 0x162   : >> { %v551_v21 = vrot.slane %v550_v40, 1 }
 0x164   : >> { %v552_v41 = vadd.f32 %v551_v21, %v550_v40 }
 0x166   : >> { %vm553_vm3 = vcmp.lt.f32.partialorder %v1652_v2, %v552_v41  ;;  %v976_v45 = vsel %vm975_vm2, %v482_v3, %v552_v41 }
 0x167   : >> { %v1145_v46 = vsel %vm553_vm3, 1.0, %v1387_v6 }
 0x168   : >> { %v556_v47 = vsel %vm486_vm0, %v1145_v46, %v1650_v63 }
 0x169   : >> { %v576_v49 = vrot.slane %v556_v47, %v575_v44 }
 0x16b   : >> { %v577_v51 = vmul.f32 %v576_v49, %v559_v23  ;;  %v578_v52 = vmul.f32 %v576_v49, %v563_v42  ;;  %v579_v53 = vmul.f32 %v576_v49, %v567_v43  ;;  %v580_v54 = vmul.f32 %v576_v49, %v571_v50 }
 0x16d   : >> { %v581_v55 = vadd.f32 %v577_v51, %v516_v18  ;;  %v582_v56 = vadd.f32 %v578_v52, %v517_v17  ;;  %v583_v57 = vadd.f32 %v579_v53, %v518_v20  ;;  %v584_v58 = vadd.f32 %v580_v54, %v519_v19  ;;  %v628_v17 = vpop.permute.xlu1 %627  ;;  %v624_v20 = vpop.permute.xlu0 %623 }
 0x16f   : >> { %v585_v60 = vmax.f32 %v581_v55, 0.0  ;;  %v587_v61 = vmax.f32 %v583_v57, 0.0  ;;  %v586_v0 = vmax.f32 %v582_v56, 0.0  ;;  %v588_v4 = vmax.f32 %v584_v58, 0.0 }
 0x171   : >> { %v605_v3 = vmul.f32 %v591_v48, %v585_v60  ;;  %v606_v5 = vmul.f32 %v595_v1, %v586_v0  ;;  %v607_v7 = vmul.f32 %v599_v59, %v587_v61  ;;  %v608_v10 = vmul.f32 %v603_v9, %v588_v4  ;;  %v636_v29 = vpop.permute.xlu1 %635  ;;  %v632_v31 = vpop.permute.xlu0 %631 }
 0x172   : >> { %v705_v60 = vsub.s32 3, %v1648_v62 }
 0x173   : >> { %v609_v8 = vadd.f32 %v606_v5, %v605_v3 }
 0x175   : >> { %v610_v11 = vadd.f32 %v609_v8, %v607_v7  ;;  %v660_v36 = vpop.permute.xlu1 %659  ;;  %v656_v39 = vpop.permute.xlu0 %655 }
 0x177   : >> { %v611_v12 = vadd.f32 %v610_v11, %v608_v10 }
 0x179   : >> { %v612_v13 = vrot.slane %v611_v12, 4  ;;  %v664_v44 = vpop.permute.xlu1 %663  ;;  %v668_v47 = vpop.permute.xlu0 %667 }
 0x17b   : >> { %v613_v14 = vadd.f32 %v612_v13, %v611_v12 }
 0x17d   : >> { %v614_v15 = vrot.slane %v613_v14, 2  ;;  %v689_v54 = vpop.permute.xlu1 %688 }
 0x17f   : >> { %v615_v16 = vadd.f32 %v614_v15, %v613_v14 }
 0x181   : >> { %v616_v18 = vrot.slane %v615_v16, 1  ;;  %v697_v59 = vpop.permute.xlu1 %696 }
 0x183   : >> { %v617_v19 = vadd.f32 %v616_v18, %v615_v16 }
 0x185   : >> { %vm618_vm5 = vcmp.lt.f32.partialorder %v1652_v2, %v617_v19  ;;  %v978_v26 = vsel %vm977_vm4, %v976_v45, %v617_v19  ;;  %v721_v3 = vpop.permute.xlu1 %720 }
 0x186   : >> { %v1146_v27 = vsel %vm618_vm5, 1.0, %v1387_v6 }
 0x187   : >> { %v621_v28 = vsel %vm486_vm0, %v1146_v27, %v1650_v63 }
 0x188   : >> { %v641_v30 = vrot.slane %v621_v28, %v640_v25 }
 0x189   : >> { %v729_v15 = vpop.permute.xlu1 %728 }
 0x18a   : >> { %v645_v32 = vmul.f32 %v641_v30, %v636_v29  ;;  %v642_v33 = vmul.f32 %v641_v30, %v624_v20  ;;  %v644_v34 = vmul.f32 %v641_v30, %v632_v31  ;;  %v643_v35 = vmul.f32 %v641_v30, %v628_v17 }
 0x18c   : >> { %v649_v37 = vadd.f32 %v645_v32, %v584_v58  ;;  %v646_v24 = vadd.f32 %v642_v33, %v581_v55  ;;  %v648_v38 = vadd.f32 %v644_v34, %v583_v57  ;;  %v647_v22 = vadd.f32 %v643_v35, %v582_v56  ;;  %v693_v58 = vpop.permute.xlu0 %692 }
 0x18d   : >> { %v733_v29 = vpop.permute.xlu1 %732 }
 0x18e   : >> { %v651_v23 = vmax.f32 %v647_v22, 0.0  ;;  %v650_v40 = vmax.f32 %v646_v24, 0.0  ;;  %v652_v21 = vmax.f32 %v648_v38, 0.0  ;;  %v653_v43 = vmax.f32 %v649_v37, 0.0 }
 0x190   : >> { %v671_v41 = vmul.f32 %v660_v36, %v651_v23  ;;  %v670_v42 = vmul.f32 %v656_v39, %v650_v40  ;;  %v672_v46 = vmul.f32 %v664_v44, %v652_v21  ;;  %v673_v49 = vmul.f32 %v668_v47, %v653_v43  ;;  %v701_v5 = vpop.permute.xlu0 %700 }
 0x191   : >> { %v770_v39 = vsub.s32 4, %v1648_v62 }
 0x192   : >> { %v674_v45 = vadd.f32 %v671_v41, %v670_v42 }
 0x194   : >> { %v675_v48 = vadd.f32 %v674_v45, %v672_v46  ;;  %v725_v19 = vpop.permute.xlu0 %724 }
 0x196   : >> { %v676_v50 = vadd.f32 %v675_v48, %v673_v49 }
 0x198   : >> { %v677_v51 = vrot.slane %v676_v50, 4 }
 0x19a   : >> { %v678_v52 = vadd.f32 %v677_v51, %v676_v50 }
 0x19c   : >> { %v679_v53 = vrot.slane %v678_v52, 2 }
 0x19e   : >> { %v680_v55 = vadd.f32 %v679_v53, %v678_v52 }
 0x1a0   : >> { %v681_v56 = vrot.slane %v680_v55, 1 }
 0x1a2   : >> { %v682_v57 = vadd.f32 %v681_v56, %v680_v55 }
 0x1a4   : >> { %vm683_vm7 = vcmp.lt.f32.partialorder %v1652_v2, %v682_v57  ;;  %v980_v61 = vsel %vm979_vm6, %v978_v26, %v682_v57 }
 0x1a5   : >> { %v1147_v0 = vsel %vm683_vm7, 1.0, %v1387_v6 }
 0x1a6   : >> { %v686_v1 = vsel %vm486_vm0, %v1147_v0, %v1650_v63 }
 0x1a7   : >> { %v706_v4 = vrot.slane %v686_v1, %v705_v60 }
 0x1a9   : >> { %v707_v7 = vmul.f32 %v706_v4, %v689_v54  ;;  %v708_v8 = vmul.f32 %v706_v4, %v693_v58  ;;  %v709_v9 = vmul.f32 %v706_v4, %v697_v59  ;;  %v710_v10 = vmul.f32 %v706_v4, %v701_v5 }
 0x1ab   : >> { %v711_v11 = vadd.f32 %v707_v7, %v646_v24  ;;  %v712_v12 = vadd.f32 %v708_v8, %v647_v22  ;;  %v713_v13 = vadd.f32 %v709_v9, %v648_v38  ;;  %v714_v14 = vadd.f32 %v710_v10, %v649_v37  ;;  %v758_v24 = vpop.permute.xlu1 %757  ;;  %v754_v22 = vpop.permute.xlu0 %753 }
 0x1ad   : >> { %v715_v16 = vmax.f32 %v711_v11, 0.0  ;;  %v717_v17 = vmax.f32 %v713_v13, 0.0  ;;  %v716_v18 = vmax.f32 %v712_v12, 0.0  ;;  %v718_v25 = vmax.f32 %v714_v14, 0.0 }
 0x1af   : >> { %v735_v20 = vmul.f32 %v721_v3, %v715_v16  ;;  %v736_v26 = vmul.f32 %v725_v19, %v716_v18  ;;  %v737_v27 = vmul.f32 %v729_v15, %v717_v17  ;;  %v738_v30 = vmul.f32 %v733_v29, %v718_v25  ;;  %v766_v21 = vpop.permute.xlu1 %765  ;;  %v762_v43 = vpop.permute.xlu0 %761 }
 0x1b0   : >> { %v835_v16 = vsub.s32 5, %v1648_v62 }
 0x1b1   : >> { %v739_v28 = vadd.f32 %v736_v26, %v735_v20 }
 0x1b3   : >> { %v740_v31 = vadd.f32 %v739_v28, %v737_v27  ;;  %v790_v48 = vpop.permute.xlu1 %789  ;;  %v786_v53 = vpop.permute.xlu0 %785 }
 0x1b5   : >> { %v741_v32 = vadd.f32 %v740_v31, %v738_v30 }
 0x1b7   : >> { %v742_v33 = vrot.slane %v741_v32, 4  ;;  %v794_v60 = vpop.permute.xlu1 %793  ;;  %v798_v1 = vpop.permute.xlu0 %797 }
 0x1b9   : >> { %v743_v34 = vadd.f32 %v742_v33, %v741_v32 }
 0x1bb   : >> { %v744_v35 = vrot.slane %v743_v34, 2  ;;  %v819_v10 = vpop.permute.xlu1 %818 }
 0x1bd   : >> { %v745_v36 = vadd.f32 %v744_v35, %v743_v34 }
 0x1bf   : >> { %v746_v37 = vrot.slane %v745_v36, 1  ;;  %v827_v15 = vpop.permute.xlu1 %826 }
 0x1c1   : >> { %v747_v38 = vadd.f32 %v746_v37, %v745_v36 }
 0x1c3   : >> { %vm748_vm9 = vcmp.lt.f32.partialorder %v1652_v2, %v747_v38  ;;  %v1686_v23 = vsel %vm981_vm8, %v980_v61, %v747_v38  ;;  %v851_v19 = vpop.permute.xlu1 %850 }
 0x1c4   : >> { %v1148_v40 = vsel %vm748_vm9, 1.0, %v1387_v6 }
 0x1c5   : >> { %v751_v41 = vsel %vm486_vm0, %v1148_v40, %v1650_v63 }
 0x1c6   : >> { %v771_v42 = vrot.slane %v751_v41, %v770_v39 }
 0x1c7   : >> { %v859_v34 = vpop.permute.xlu1 %858 }
 0x1c8   : >> { %v775_v44 = vmul.f32 %v771_v42, %v766_v21  ;;  %v772_v45 = vmul.f32 %v771_v42, %v754_v22  ;;  %v774_v46 = vmul.f32 %v771_v42, %v762_v43  ;;  %v773_v47 = vmul.f32 %v771_v42, %v758_v24 }
 0x1ca   : >> { %v779_v49 = vadd.f32 %v775_v44, %v714_v14  ;;  %v776_v50 = vadd.f32 %v772_v45, %v711_v11  ;;  %v778_v51 = vadd.f32 %v774_v46, %v713_v13  ;;  %v777_v52 = vadd.f32 %v773_v47, %v712_v12  ;;  %v823_v14 = vpop.permute.xlu0 %822 }
 0x1cb   : >> { %v863_v41 = vpop.permute.xlu1 %862 }
 0x1cc   : >> { %v781_v54 = vmax.f32 %v777_v52, 0.0  ;;  %v780_v55 = vmax.f32 %v776_v50, 0.0  ;;  %v782_v56 = vmax.f32 %v778_v51, 0.0  ;;  %v783_v59 = vmax.f32 %v779_v49, 0.0 }
 0x1ce   : >> { %v801_v57 = vmul.f32 %v790_v48, %v781_v54  ;;  %v800_v58 = vmul.f32 %v786_v53, %v780_v55  ;;  %v802_v0 = vmul.f32 %v794_v60, %v782_v56  ;;  %v803_v4 = vmul.f32 %v798_v1, %v783_v59  ;;  %v831_v25 = vpop.permute.xlu0 %830 }
 0x1cf   : >> { %v900_v53 = vsub.s32 6, %v1648_v62 }
 0x1d0   : >> { %v804_v61 = vadd.f32 %v801_v57, %v800_v58 }
 0x1d2   : >> { %v805_v3 = vadd.f32 %v804_v61, %v802_v0  ;;  %v855_v37 = vpop.permute.xlu0 %854 }
 0x1d4   : >> { %v806_v5 = vadd.f32 %v805_v3, %v803_v4 }
 0x1d6   : >> { %v807_v7 = vrot.slane %v806_v5, 4 }
 0x1d8   : >> { %v808_v8 = vadd.f32 %v807_v7, %v806_v5 }
 0x1da   : >> { %v809_v9 = vrot.slane %v808_v8, 2 }
 0x1dc   : >> { %v810_v11 = vadd.f32 %v809_v9, %v808_v8 }
 0x1de   : >> { %v811_v12 = vrot.slane %v810_v11, 1 }
 0x1e0   : >> { %v1692_v13 = vadd.f32 %v811_v12, %v810_v11 }
 0x1e2   : >> { %vm813_vm10 = vcmp.lt.f32.partialorder %v1652_v2, %v1692_v13 }
 0x1e3   : >> { %v1149_v17 = vsel %vm813_vm10, 1.0, %v1387_v6 }
 0x1e4   : >> { %v816_v18 = vsel %vm486_vm0, %v1149_v17, %v1650_v63 }
 0x1e5   : >> { %v836_v20 = vrot.slane %v816_v18, %v835_v16 }
 0x1e7   : >> { %v837_v26 = vmul.f32 %v836_v20, %v819_v10  ;;  %v838_v27 = vmul.f32 %v836_v20, %v823_v14  ;;  %v839_v28 = vmul.f32 %v836_v20, %v827_v15  ;;  %v840_v29 = vmul.f32 %v836_v20, %v831_v25 }
 0x1e9   : >> { %v841_v30 = vadd.f32 %v837_v26, %v776_v50  ;;  %v842_v31 = vadd.f32 %v838_v27, %v777_v52  ;;  %v843_v32 = vadd.f32 %v839_v28, %v778_v51  ;;  %v844_v33 = vadd.f32 %v840_v29, %v779_v49  ;;  %v888_v50 = vpop.permute.xlu1 %887  ;;  %v884_v52 = vpop.permute.xlu0 %883 }
 0x1eb   : >> { %v845_v35 = vmax.f32 %v841_v30, 0.0  ;;  %v847_v36 = vmax.f32 %v843_v32, 0.0  ;;  %v846_v24 = vmax.f32 %v842_v31, 0.0  ;;  %v848_v22 = vmax.f32 %v844_v33, 0.0 }
 0x1ed   : >> { %v865_v38 = vmul.f32 %v851_v19, %v845_v35  ;;  %v866_v39 = vmul.f32 %v855_v37, %v846_v24  ;;  %v867_v40 = vmul.f32 %v859_v34, %v847_v36  ;;  %v868_v42 = vmul.f32 %v863_v41, %v848_v22  ;;  %v896_v55 = vpop.permute.xlu1 %895  ;;  %v892_v58 = vpop.permute.xlu0 %891 }
 0x1ee   : >> { %v984_v36 = vsel %vm983_vm12, %v1686_v23, %v1692_v13  ;;  %v965_v24 = vsub.s32 7, %v1648_v62 }
 0x1ef   : >> { %v869_v21 = vadd.f32 %v866_v39, %v865_v38 }
 0x1f1   : >> { %v870_v43 = vadd.f32 %v869_v21, %v867_v40  ;;  %v920_v1 = vpop.permute.xlu1 %919  ;;  %v916_v8 = vpop.permute.xlu0 %915 }
 0x1f3   : >> { %v871_v44 = vadd.f32 %v870_v43, %v868_v42 }
 0x1f5   : >> { %v872_v45 = vrot.slane %v871_v44, 4  ;;  %v924_v16 = vpop.permute.xlu1 %923  ;;  %v928_v19 = vpop.permute.xlu0 %927 }
 0x1f7   : >> { %v873_v46 = vadd.f32 %v872_v45, %v871_v44 }
 0x1f9   : >> { %v874_v47 = vrot.slane %v873_v46, 2  ;;  %v992_v29 = vpop.permute.xlu1 %991  ;;  %v949_v34 = vpop.permute.xlu0 %948 }
 0x1fb   : >> { %v875_v48 = vadd.f32 %v874_v47, %v873_v46 }
 0x1fd   : >> { %v876_v49 = vrot.slane %v875_v48, 1  ;;  %v957_v43 = vpop.permute.xlu0 %956 }
 0x1ff   : >> { %v877_v51 = vadd.f32 %v876_v49, %v875_v48 }
 0x201   : >> { %vm878_vm11 = vcmp.lt.f32.partialorder %v1652_v2, %v877_v51  ;;  %v986_v37 = vsel %vm985_vm13, %v984_v36, %v877_v51 }
 0x202   : >> { %v1150_v54 = vsel %vm878_vm11, 1.0, %v1387_v6 }
 0x203   : >> { %v881_v56 = vsel %vm486_vm0, %v1150_v54, %v1650_v63 }
 0x204   : >> { %v901_v57 = vrot.slane %v881_v56, %v900_v53 }
 0x206   : >> { %v905_v59 = vmul.f32 %v901_v57, %v896_v55  ;;  %v902_v60 = vmul.f32 %v901_v57, %v884_v52  ;;  %v904_v61 = vmul.f32 %v901_v57, %v892_v58  ;;  %v903_v0 = vmul.f32 %v901_v57, %v888_v50 }
 0x208   : >> { %v909_v3 = vadd.f32 %v905_v59, %v844_v33  ;;  %v906_v4 = vadd.f32 %v902_v60, %v841_v30  ;;  %v908_v5 = vadd.f32 %v904_v61, %v843_v32  ;;  %v907_v7 = vadd.f32 %v903_v0, %v842_v31  ;;  %v953_v33 = vpop.permute.xlu1 %952 }
 0x20a   : >> { %v910_v9 = vmax.f32 %v906_v4, 0.0  ;;  %v911_v10 = vmax.f32 %v907_v7, 0.0  ;;  %v912_v11 = vmax.f32 %v908_v5, 0.0  ;;  %v913_v14 = vmax.f32 %v909_v3, 0.0 }
 0x20c   : >> { %v930_v12 = vmul.f32 %v916_v8, %v910_v9  ;;  %v931_v15 = vmul.f32 %v920_v1, %v911_v10  ;;  %v932_v18 = vmul.f32 %v924_v16, %v912_v11  ;;  %v933_v20 = vmul.f32 %v928_v19, %v913_v14  ;;  %v961_v42 = vpop.permute.xlu1 %960 }
 0x20e   : >> { %v934_v17 = vadd.f32 %v931_v15, %v930_v12 }
 0x210   : >> { %v935_v25 = vadd.f32 %v934_v17, %v932_v18 }
 0x212   : >> { %v936_v26 = vadd.f32 %v935_v25, %v933_v20 }
 0x214   : >> { %v937_v27 = vrot.slane %v936_v26, 4 }
 0x216   : >> { %v938_v28 = vadd.f32 %v937_v27, %v936_v26 }
 0x218   : >> { %v939_v30 = vrot.slane %v938_v28, 2 }
 0x21a   : >> { %v940_v32 = vadd.f32 %v939_v30, %v938_v28 }
 0x21c   : >> { %v941_v31 = vrot.slane %v940_v32, 1 }
 0x21e   : >> { %v942_v35 = vadd.f32 %v941_v31, %v940_v32 }
 0x220   : >> { %vm943_vm15 = vcmp.lt.f32.partialorder %v1652_v2, %v942_v35  ;;  %v988_v38 = vsel %vm987_vm14, %v986_v37, %v942_v35 }
 0x221   : >> { %v1151_v22 = vsel %vm943_vm15, 1.0, %v1387_v6  ;;  %v994_v39 = vadd.f32 %v992_v29, %v988_v38 }
 0x222   : >> { %v946_v40 = vsel %vm486_vm0, %v1151_v22, %v1650_v63 }
 0x223   : >> { %v966_v21 = vrot.slane %v946_v40, %v965_v24  ;;  %v1152_v41 = vmul.f32 -1.442695, %v994_v39 }
 0x225   : >> { %v967_v23 = vmul.f32 %v966_v21, %v949_v34  ;;  %v969_v13 = vmul.f32 %v966_v21, %v957_v43  ;;  %1270 = vpow2.f32 %v1152_v41  ;;  %v968_v62 = vmul.f32 %v966_v21, %v953_v33 }
 0x226   : >> { %v970_v44 = vmul.f32 %v966_v21, %v961_v42 }
 0x227   : >> { %v971_v22 = vadd.f32 %v967_v23, %v906_v4   ;;  %v973_v21 = vadd.f32 %v969_v13, %v908_v5   ;;  %v972_v24 = vadd.f32 %v968_v62, %v907_v7  }
 0x228   : >> { %v974_v23 = vadd.f32 %v970_v44, %v909_v3  }
 0x22f   : >> { %v1271_v2 = vpop.eup %1270 }
 0x230   : >> { %v998_v6 = vadd.f32 1.0, %v1271_v2 }
 0x232   : >> { %1272 = vrcp.f32 %v998_v6 }
 0x237   : > { %422 = sbr.rel (!%p420_p13) target bundleno = 172 (0xac), region = 181 }
 0x23c   : >> { %v1273_v63 = vpop.eup %1272 }
 0x23d   : >> { %1002 = vst [vmem:[%s1001_s12] sm:$0xff] %v1273_v63 }
 0x23e   : > { %1287 = shalt.err (!%p1284_p7)
}
 0x23f   : > { %s1288_s17 = scalar_lea.hbm %s1734_s16, 1024  ;;  %s1292_s10 = scalar_lea.hbm %s1790_s6, 2048 }
 0x240   : > { %p1289_p10 = scmp.ne.s32.totalorder %s1734_s16, %s1288_s17  ;;  %p1293_p13 = scmp.lt.u32.totalorder %s1734_s16, %s1790_s6 }
 0x241   : > { %p1294_p0 = scmp.lt.u32.totalorder %s1292_s10, %s1288_s17  ;;  %p1296_p2 = scmp.lt.u32.totalorder %s1288_s17, %s1734_s16 }
 0x242   : > { %p1290_p11 = pnand %p1289_p10, %p1469_p6 }
 0x243   : > { %p1295_p1 = por %p1294_p0, %p1293_p13 }
 0x244   : > { %p1291_p12 = pneg %p1290_p11 }
 0x245   : > { %p1297_p3 = por %p1296_p2, %p1295_p1 }
 0x247   : > { %p1298_p4 = pnand %p1297_p3, %p1291_p12 }
 0x249   : > { %1301 = shalt.err (!%p1298_p4)
}
 0x24a   : > { %s1389_s13 = smov 128   ;;  %s1390_s14 = smov 256  }
 0x24b   : > { %s1391_s15 = smov 8  }
 0x24c   : > { %1157 = dma.vmem_to_hbm [thread:$0]  (%p1469_p6), %s1738_s29, 1024, %s1734_s16, %s1742_s28, %s1389_s13, %s1390_s14, %s1391_s15  }
 0x24d PF: > { %s1031_s19 = sand.u32 1, %s1344_s21   ;;  %p1160_p5 = pnand %p1133_p9, %p1473_p8 }
 0x24e   : > { %s1032_s25 = scalar_lea.sflag [#allocation5], %s1031_s19 }
 0x24f   : > { %1339 = dma.done.wait (!%p1160_p5), %s1032_s25, 1024  }
 0x250   : > { %1341 = vsyncadd (!%p1160_p5), %s1032_s25, 4294966272  ;;  %p16_p7 = scmp.ge.s32.totalorder %s1450_s27, 4   ;;  %s1794_s21 = smov %s1348_s22 }
 0x251   : > { %s1795_s22 = smov %s1352_s23  ;;  %s1796_s23 = smov %s1463_s30 }
 0x252   : > { %s1797_s24 = smov %s1450_s27  ;;  %18 = sbr.rel (!%p16_p7) target bundleno = 3 (0x3), region = 192 }
 0x259   :  { %1037 = vsyncpa [#allocation5], 1 }
 0x25a   :  { %1039 = vsyncpa [#allocation5 + $0x1], 1 }

</bundles_post_ra>
